<compile_context>
chip_gen: v6e
topology: v6e:2x2x1
jax: 0.10.0
libtpu: 0.0.40
codegen_flags: <defaults>
</compile_context>

<pallas_src>
from math import sqrt, pi

import numpy as np
import jax
import jax.numpy as jnp
from jax.experimental import pallas as pl
from jax.experimental.pallas import tpu as pltpu


# ----------------------------------------------------------------------------
# configuration
# ----------------------------------------------------------------------------
MUL = 8
IRREPS_IN = ((MUL, 0, +1), (MUL, 1, -1), (MUL, 1, +1))   # (mul, l, parity)
IRREPS_OUT = ((MUL, 0, +1), (MUL, 1, -1), (MUL, 1, +1))
LMAX_SH = 10
USE_BIAS = True

BATCH = 1000      # deliberately NOT a multiple of TB: exercises the tail path
TB = 512          # batch tile (lanes) per grid step; B=1000 -> nb=2 (one per v7x TC)


def irreps_dim(irreps):
    return sum(mul * (2 * l + 1) for mul, l, _ in irreps)


def irreps_slices(irreps):
    out, off = [], 0
    for mul, l, _ in irreps:
        d = mul * (2 * l + 1)
        out.append((off, off + d))
        off += d
    return out


DIN = irreps_dim(IRREPS_IN)     # 56
DOUT = irreps_dim(IRREPS_OUT)   # 56
DIN_PAD = 64                    # DIN + 1 bias column + 7 zero cols (8-aligned)


# ----------------------------------------------------------------------------
# structural constants (what the torch __init__ computes with e3nn)
# ----------------------------------------------------------------------------
def sh_norm_at_pole(l):
    # e3nn spherical_harmonics(l, (0,1,0), normalize=True, normalization='integral'),
    # m=0 component.
    return sqrt((2 * l + 1) / (4.0 * pi))


def wigner_3j(l1, l2, l3):
    """Real-basis Wigner 3j tensors for the small (l1,l2,l3) triples needed here."""
    key = (l1, l2, l3)
    if key == (0, 0, 0):
        return np.ones((1, 1, 1))
    if key == (1, 1, 0):
        w = np.zeros((3, 3, 1))
        w[np.arange(3), np.arange(3), 0] = 1.0 / sqrt(3.0)
        return w
    if key == (0, 1, 1):
        w = np.zeros((1, 3, 3))
        w[0, np.arange(3), np.arange(3)] = 1.0 / sqrt(3.0)
        return w
    if key == (1, 0, 1):
        w = np.zeros((3, 1, 3))
        w[np.arange(3), 0, np.arange(3)] = 1.0 / sqrt(3.0)
        return w
    if key == (1, 1, 1):
        eps = np.zeros((3, 3, 3))
        eps[0, 1, 2] = eps[1, 2, 0] = eps[2, 0, 1] = 1.0
        eps[0, 2, 1] = eps[2, 1, 0] = eps[1, 0, 2] = -1.0
        return eps / sqrt(6.0)
    if key == (1, 2, 1):
        s = sqrt(3.0) / 2.0
        S = np.zeros((5, 3, 3))
        S[0] = [[0, 0, s], [0, 0, 0], [s, 0, 0]]
        S[1] = [[0, s, 0], [s, 0, 0], [0, 0, 0]]
        S[2] = np.diag([-0.5, 1.0, -0.5])
        S[3] = [[0, 0, 0], [0, 0, s], [0, s, 0]]
        S[4] = np.diag([-s, 0.0, s])
        return np.transpose(S, (1, 0, 2)) / sqrt(7.5)
    raise NotImplementedError(key)


def _path_valid(lo, po, li, pi, lf):
    return (po == pi * ((-1) ** lf)) and (abs(li - lf) <= lo <= li + lf)


def build_structure():
    sliceout = irreps_slices(IRREPS_OUT)
    slicein = irreps_slices(IRREPS_IN)

    out_hmo, in_hmo = [], []
    out_pos, out_neg, in_pos, in_neg = [], [], [], []
    for o_idx, (_, lo, po) in enumerate(IRREPS_OUT):
        for i_idx, (_, li, pi) in enumerate(IRREPS_IN):
            for lf in range(LMAX_SH + 1):
                if _path_valid(lo, po, li, pi, lf):
                    so, eo = sliceout[o_idx]
                    si, ei = slicein[i_idx]
                    out_hmo.append(list(range(so + lo, eo, 2 * lo + 1)))
                    in_hmo.append(list(range(si + li, ei, 2 * li + 1)))
                    for mo in range(1, min(lo, li) + 1):
                        out_pos.append(list(range(so + lo + mo, eo, 2 * lo + 1)))
                        out_neg.append(list(range(so + lo - mo, eo, 2 * lo + 1)))
                        in_pos.append(list(range(si + li + mo, ei, 2 * li + 1)))
                        in_neg.append(list(range(si + li - mo, ei, 2 * li + 1)))
                    break

    valids = {}
    for o_idx, (_, lo, po) in enumerate(IRREPS_OUT):
        for i_idx, (_, li, pi) in enumerate(IRREPS_IN):
            for lf in range(LMAX_SH + 1):
                if _path_valid(lo, po, li, pi, lf):
                    valids.setdefault((o_idx, i_idx), []).append(lf)

    # irrep_normalization='component', path_normalization='element'
    norm_coeff = []
    for (o_idx, i_idx), lfs in valids.items():
        alpha = 2 * IRREPS_OUT[o_idx][1] + 1
        x = sum(IRREPS_IN[i_b][0] * len(lfs_b)
                for (o_b, i_b), lfs_b in valids.items() if o_b == o_idx)
        if x > 0:
            alpha = alpha / x
        norm_coeff.append(sqrt(alpha))

    hzero, hpos, hneg = [], [], []
    for (o_idx, i_idx), lfs in valids.items():
        lo = IRREPS_OUT[o_idx][1]
        li = IRREPS_IN[i_idx][1]
        cz = 0.0
        cp, cn = [], []
        for lf in lfs:
            wig = wigner_3j(li, lf, lo)
            cz += sh_norm_at_pole(lf) * wig[li, lf, lo]
        for m in range(1, min(lo, li) + 1):
            tp, tn = 0.0, 0.0
            for lf in lfs:
                wig = wigner_3j(li, lf, lo)
                f = sh_norm_at_pole(lf)
                tp += f * wig[li + m, lf, lo + m]
                tn += f * wig[li + m, lf, lo - m]
            cp.append(float(tp))
            cn.append(float(tn))
        hzero.append(float(cz))
        hpos.append(cp)
        hneg.append(cn)

    for n, c in enumerate(norm_coeff):
        hzero[n] = float(hzero[n] * c)
        hpos[n] = [float(v * c) for v in hpos[n]]
        hneg[n] = [float(v * c) for v in hneg[n]]

    validweights = sum(IRREPS_OUT[o][0] * IRREPS_IN[i][0] for (o, i) in valids)
    return dict(out_hmo=out_hmo, in_hmo=in_hmo,
                out_pos=out_pos, out_neg=out_neg, in_pos=in_pos, in_neg=in_neg,
                hzero=hzero, hpos=hpos, hneg=hneg, validweights=validweights)


# ----------------------------------------------------------------------------
# glue: assemble the dense SO(2) tensor-product matrix from shared weights,
# and layout permutations (interleaved <-> de-interleaved)
# ----------------------------------------------------------------------------
def assemble_tp_matrix(s_weight, st):
    M = jnp.zeros((DOUT, DIN), jnp.float32)
    strider, another = 0, 0
    for idx, hz in enumerate(st['hzero']):
        oi, ii = st['out_hmo'][idx], st['in_hmo'][idx]
        n_o, n_i = len(oi), len(ii)
        W = s_weight[strider:strider + n_o * n_i].reshape(n_o, n_i)
        if hz != 0:
            M = M.at[np.ix_(oi, ii)].add(hz * W)
        for ms in range(len(st['hpos'][idx])):
            op, on = st['out_pos'][another], st['out_neg'][another]
            ip, inn = st['in_pos'][another], st['in_neg'][another]
            hp, hn = st['hpos'][idx][ms], st['hneg'][idx][ms]
            if hp != 0 or hn != 0:
                M = M.at[np.ix_(op, ip)].add(hp * W)
                M = M.at[np.ix_(op, inn)].add(-hn * W)
                M = M.at[np.ix_(on, ip)].add(hn * W)
                M = M.at[np.ix_(on, inn)].add(hp * W)
            another += 1
        strider += n_o * n_i
    return M


def deinterleave_perm(irreps):
    perm = []
    for (mul, l, _), (s, _) in zip(irreps, irreps_slices(irreps)):
        dim = 2 * l + 1
        for j in range(dim):
            for c in range(mul):
                perm.append(s + c * dim + j)
    return np.array(perm, dtype=np.int32)


# ----------------------------------------------------------------------------
# Pallas kernel (channel-on-sublane / batch-on-lane layout)
# ----------------------------------------------------------------------------
def _tp_kernel(x_ref, d_ref, mt_ref, o_ref):
    # x_ref : (DIN, TB)       de-interleaved input, batch on lanes
    # d_ref : (16, TB)        per-sample l=1 Wigner-D, row-major flat in rows 0..8
    # mt_ref: (DOUT, DIN_PAD) de-interleaved TP matrix; col 56 = bias, 57..63 = 0
    # o_ref : (DOUT, TB)
    tb = x_ref.shape[1]
    d = d_ref[...]

    # ---- stage 1: input O(2) transform -------------------------------------
    # Hoist the nine D-coefficient sublane-broadcasts once for this stage and
    # reuse them for both l=1 input irreps (instead of re-broadcasting 18x).
    db = [jnp.broadcast_to(d[k:k + 1, :], (MUL, tb)) for k in range(9)]
    slabs = []
    off = 0
    for (mul, l, _) in IRREPS_IN:
        if l == 0:
            slabs.append(x_ref[off:off + mul, :])
            off += mul
        else:  # l == 1: three contiguous (MUL, TB) m-group slabs, D[i, j] = d[3*i + j]
            g0 = x_ref[off + 0 * mul: off + 1 * mul, :]
            g1 = x_ref[off + 1 * mul: off + 2 * mul, :]
            g2 = x_ref[off + 2 * mul: off + 3 * mul, :]
            for i in range(3):
                slabs.append(db[3 * i + 0] * g0 + db[3 * i + 1] * g1 + db[3 * i + 2] * g2)
            off += 3 * mul

    # Bias slab: row 0 = ones, rows 1..7 = zeros.  Together with the bias column
    # of mt this folds the bias add into the single fused matmul (K 56 -> 64,
    # keeping every slab 8-sublane aligned so the concatenate stays copy-free).
    sub = jax.lax.broadcasted_iota(jnp.int32, (DIN_PAD - DIN, tb), 0)
    slabs.append(jnp.where(sub == 0, 1.0, 0.0).astype(jnp.float32))
    x_rot = jnp.concatenate(slabs, axis=0)                         # (DIN_PAD, TB)

    # ---- stage 2: single fused SO(2) tensor-product matmul (+bias) ---------
    y = jnp.dot(mt_ref[...], x_rot, preferred_element_type=jnp.float32)   # (DOUT, TB)

    # ---- stage 3: output O(2) transform with D^T, direct row-slab stores ----
    db = [jnp.broadcast_to(d[k:k + 1, :], (MUL, tb)) for k in range(9)]
    off = 0
    for (mul, l, _) in IRREPS_OUT:
        if l == 0:
            o_ref[off:off + mul, :] = y[off:off + mul, :]          # bias already folded in
            off += mul
        else:  # l == 1, coefficient D^T[i, j] = D[j, i] = d[3*j + i]
            g0 = y[off + 0 * mul: off + 1 * mul, :]
            g1 = y[off + 1 * mul: off + 2 * mul, :]
            g2 = y[off + 2 * mul: off + 3 * mul, :]
            for i in range(3):
                o_ref[off + i * mul: off + (i + 1) * mul, :] = (
                    db[0 + i] * g0 + db[3 + i] * g1 + db[6 + i] * g2)
            off += 3 * mul


def make_forward(mt_aug_de, perm_in, inv_perm_out, *, tb=TB):
    """Builds the jitted forward.  The permutations are numpy compile-time
    constants closed over by the jit so the gathers fuse with the transpose/pad
    copies (no dynamic-gather HLOs, no extra HBM passes)."""
    perm_in = np.asarray(perm_in, dtype=np.int32)
    inv_perm_out = np.asarray(inv_perm_out, dtype=np.int32)
    mt_aug_de = jnp.asarray(mt_aug_de, jnp.float32)

    @jax.jit
    def fwd(data_in1, D1):
        B = data_in1.shape[0]
        nb = pl.cdiv(B, tb)            # tail handled by padding, never dropped
        b_pad = nb * tb

        # One fused (static) transpose + permute per side.
        # (B, DIN) batch-major interleaved -> (DIN, B) de-interleaved, batch-on-lane.
        x_t = jnp.transpose(data_in1)[perm_in, :]
        d_t = jnp.reshape(D1, (B, 9)).T                              # (9, B)
        if b_pad != B:
            x_t = jnp.pad(x_t, ((0, 0), (0, b_pad - B)))
        d_t = jnp.pad(d_t, ((0, 16 - 9), (0, b_pad - B)))            # (16, b_pad)

        out_t = pl.pallas_call(
            _tp_kernel,
            out_shape=jax.ShapeDtypeStruct((DOUT, b_pad), jnp.float32),
            grid=(nb,),
            in_specs=[
                pl.BlockSpec((DIN, tb), lambda i: (0, i)),
                pl.BlockSpec((16, tb), lambda i: (0, i)),
                pl.BlockSpec((DOUT, DIN_PAD), lambda i: (0, 0)),     # weights resident
            ],
            out_specs=pl.BlockSpec((DOUT, tb), lambda i: (0, i)),
            compiler_params=pltpu.CompilerParams(
                dimension_semantics=("parallel",)),
        )(x_t, d_t, mt_aug_de)

        # Glue back: (DOUT, b_pad) de-interleaved -> (B, DOUT) interleaved.
        return jnp.transpose(out_t[inv_perm_out, :])[:B]

    return fwd


# ----------------------------------------------------------------------------
# pure-JAX reference that mirrors the PyTorch forward loop literally
# ----------------------------------------------------------------------------
def reference_forward(x, D1, s_weight, bias_full, st):
    data = x
    strider = 0
    for (mul, l, _) in IRREPS_IN:              # input transform ('both')
        dim = 2 * l + 1
        if l != 0:
            for _ in range(mul):
                blk = data[:, strider:strider + dim]
                data = data.at[:, strider:strider + dim].set(
                    jnp.einsum('bij,bj->bi', D1, blk))
                strider += dim
        else:
            strider += mul

    out = jnp.zeros((data.shape[0], DOUT), jnp.float32)
    strider, another = 0, 0
    for idx, hz in enumerate(st['hzero']):
        oi = np.array(st['out_hmo'][idx]); ii = np.array(st['in_hmo'][idx])
        mat_size = len(oi) * len(ii)
        W = s_weight[strider:strider + mat_size].reshape(len(oi), len(ii))
        if hz != 0:
            out = out.at[:, oi].add(jnp.einsum('ij,bj->bi', hz * W, data[:, ii]))
        for ms in range(len(st['hpos'][idx])):
            op = np.array(st['out_pos'][another]); on = np.array(st['out_neg'][another])
            ip = np.array(st['in_pos'][another]); inn = np.array(st['in_neg'][another])
            hp, hn = st['hpos'][idx][ms], st['hneg'][idx][ms]
            if hp != 0 or hn != 0:
                out = out.at[:, op].add(
                    jnp.einsum('ij,bj->bi', hp * W, data[:, ip])
                    - jnp.einsum('ij,bj->bi', hn * W, data[:, inn]))
                out = out.at[:, on].add(
                    jnp.einsum('ij,bj->bi', hn * W, data[:, ip])
                    + jnp.einsum('ij,bj->bi', hp * W, data[:, inn]))
            another += 1
        strider += mat_size

    strider = 0
    for (mul, l, _) in IRREPS_OUT:             # output transform with D^T
        dim = 2 * l + 1
        if l != 0:
            for _ in range(mul):
                blk = out[:, strider:strider + dim]
                out = out.at[:, strider:strider + dim].set(
                    jnp.einsum('bji,bj->bi', D1, blk))
                strider += dim
        else:
            strider += mul

    return out + bias_full[None, :]


# ----------------------------------------------------------------------------
if __name__ == "__main__":
    key = jax.random.PRNGKey(0)
    k_x, k_d, k_w, k_b = jax.random.split(key, 4)

    st = build_structure()

    # parameters (deterministic, synthetic init as in __init__)
    s_weight = jax.random.uniform(k_w, (st['validweights'],), jnp.float32, -1.0, 1.0)
    bias_idx = []
    for (mul, l, _), (s, e) in zip(IRREPS_OUT, irreps_slices(IRREPS_OUT)):
        if l == 0:
            bias_idx.extend(range(s, e))
    bias_vals = (jax.random.uniform(k_b, (len(bias_idx),), jnp.float32, -1.0, 1.0)
                 if USE_BIAS else jnp.zeros((len(bias_idx),), jnp.float32))
    bias_full = jnp.zeros((DOUT,), jnp.float32).at[np.array(bias_idx)].set(bias_vals)

    # inputs
    data_in1 = jax.random.normal(k_x, (BATCH, DIN), jnp.float32)
    A = jax.random.normal(k_d, (BATCH, 3, 3), jnp.float32)
    Q, _ = jnp.linalg.qr(A)                    # per-sample l=1 Wigner-D (rotation-like)
    D1 = Q.astype(jnp.float32)                 # (B, 3, 3)

    # assemble TP matrix (parameter setup; pure glue) and layout permutations
    M = assemble_tp_matrix(s_weight, st)
    perm_in = deinterleave_perm(IRREPS_IN)
    perm_out = deinterleave_perm(IRREPS_OUT)
    inv_perm_out = np.argsort(perm_out).astype(np.int32)
    mt_de = M[np.ix_(perm_out, perm_in)]                 # (DOUT, DIN), de-interleaved
    bias_de = bias_full[perm_out]                        # (DOUT,),    de-interleaved
    # fold bias into the fused matmul: col 56 = bias, cols 57..63 = 0 (8-aligned pad)
    mt_aug = jnp.concatenate(
        [mt_de, bias_de[:, None],
         jnp.zeros((DOUT, DIN_PAD - DIN - 1), jnp.float32)], axis=1)   # (DOUT, DIN_PAD)

    # build + run the Pallas forward (permutations baked in as static constants)
    fwd = make_forward(mt_aug, perm_in, inv_perm_out)
    out = jax.block_until_ready(fwd(data_in1, D1))

    # validate against the literal per-path reference
    ref = reference_forward(data_in1, D1, s_weight, bias_full, st)
    err = float(jnp.max(jnp.abs(out - ref)))
    assert err < 5e-4, f"kernel/reference mismatch: max abs err = {err}"
    print("KERNEL_OK")
</pallas_src>

<mosaic_0001>
module attributes {stable_mosaic.version = 11 : i64} {
  func.func @_tp_kernel(%arg0: i32, %arg1: memref<56x512xf32, #tpu.memory_space<vmem>>, %arg2: memref<16x512xf32, #tpu.memory_space<vmem>>, %arg3: memref<56x64xf32, #tpu.memory_space<vmem>>, %arg4: memref<56x512xf32, #tpu.memory_space<vmem>>) attributes {dimension_semantics = [#tpu.dimension_semantics<parallel>], iteration_bounds = array<i64: 2>, scalar_prefetch = 0 : i64, scratch_operands = 0 : i64, tpu.core_type = #tpu.core_type<tc>, window_params = [{transform_indices = @transform_0, window_bounds = array<i64: 56, 512>}, {transform_indices = @transform_1, window_bounds = array<i64: 16, 512>}, {pipeline_mode = #tpu.pipeline_mode<synchronous>, transform_indices = @transform_2, window_bounds = array<i64: 56, 64>}, {transform_indices = @transform_3, window_bounds = array<i64: 56, 512>}]} {
    %c0 = arith.constant 0 : index
    %c0_0 = arith.constant 0 : index
    %0 = vector.load %arg2[%c0, %c0_0] : memref<16x512xf32, #tpu.memory_space<vmem>>, vector<16x512xf32>
    %1 = vector.extract_strided_slice %0 {offsets = [0, 0], sizes = [1, 512], strides = [1, 1]} : vector<16x512xf32> to vector<1x512xf32>
    %2 = vector.shape_cast %1 : vector<1x512xf32> to vector<1x512xf32>
    %3 = vector.broadcast %2 : vector<1x512xf32> to vector<8x512xf32>
    %4 = vector.extract_strided_slice %0 {offsets = [1, 0], sizes = [1, 512], strides = [1, 1]} : vector<16x512xf32> to vector<1x512xf32>
    %5 = vector.shape_cast %4 : vector<1x512xf32> to vector<1x512xf32>
    %6 = vector.broadcast %5 : vector<1x512xf32> to vector<8x512xf32>
    %7 = vector.extract_strided_slice %0 {offsets = [2, 0], sizes = [1, 512], strides = [1, 1]} : vector<16x512xf32> to vector<1x512xf32>
    %8 = vector.shape_cast %7 : vector<1x512xf32> to vector<1x512xf32>
    %9 = vector.broadcast %8 : vector<1x512xf32> to vector<8x512xf32>
    %10 = vector.extract_strided_slice %0 {offsets = [3, 0], sizes = [1, 512], strides = [1, 1]} : vector<16x512xf32> to vector<1x512xf32>
    %11 = vector.shape_cast %10 : vector<1x512xf32> to vector<1x512xf32>
    %12 = vector.broadcast %11 : vector<1x512xf32> to vector<8x512xf32>
    %13 = vector.extract_strided_slice %0 {offsets = [4, 0], sizes = [1, 512], strides = [1, 1]} : vector<16x512xf32> to vector<1x512xf32>
    %14 = vector.shape_cast %13 : vector<1x512xf32> to vector<1x512xf32>
    %15 = vector.broadcast %14 : vector<1x512xf32> to vector<8x512xf32>
    %16 = vector.extract_strided_slice %0 {offsets = [5, 0], sizes = [1, 512], strides = [1, 1]} : vector<16x512xf32> to vector<1x512xf32>
    %17 = vector.shape_cast %16 : vector<1x512xf32> to vector<1x512xf32>
    %18 = vector.broadcast %17 : vector<1x512xf32> to vector<8x512xf32>
    %19 = vector.extract_strided_slice %0 {offsets = [6, 0], sizes = [1, 512], strides = [1, 1]} : vector<16x512xf32> to vector<1x512xf32>
    %20 = vector.shape_cast %19 : vector<1x512xf32> to vector<1x512xf32>
    %21 = vector.broadcast %20 : vector<1x512xf32> to vector<8x512xf32>
    %22 = vector.extract_strided_slice %0 {offsets = [7, 0], sizes = [1, 512], strides = [1, 1]} : vector<16x512xf32> to vector<1x512xf32>
    %23 = vector.shape_cast %22 : vector<1x512xf32> to vector<1x512xf32>
    %24 = vector.broadcast %23 : vector<1x512xf32> to vector<8x512xf32>
    %25 = vector.extract_strided_slice %0 {offsets = [8, 0], sizes = [1, 512], strides = [1, 1]} : vector<16x512xf32> to vector<1x512xf32>
    %26 = vector.shape_cast %25 : vector<1x512xf32> to vector<1x512xf32>
    %27 = vector.broadcast %26 : vector<1x512xf32> to vector<8x512xf32>
    %c0_1 = arith.constant 0 : index
    %c0_2 = arith.constant 0 : index
    %28 = vector.load %arg1[%c0_1, %c0_2] : memref<56x512xf32, #tpu.memory_space<vmem>>, vector<8x512xf32>
    %c8 = arith.constant 8 : index
    %c0_3 = arith.constant 0 : index
    %29 = vector.load %arg1[%c8, %c0_3] : memref<56x512xf32, #tpu.memory_space<vmem>>, vector<8x512xf32>
    %c16 = arith.constant 16 : index
    %c0_4 = arith.constant 0 : index
    %30 = vector.load %arg1[%c16, %c0_4] : memref<56x512xf32, #tpu.memory_space<vmem>>, vector<8x512xf32>
    %c24 = arith.constant 24 : index
    %c0_5 = arith.constant 0 : index
    %31 = vector.load %arg1[%c24, %c0_5] : memref<56x512xf32, #tpu.memory_space<vmem>>, vector<8x512xf32>
    %32 = arith.mulf %3, %29 : vector<8x512xf32>
    %33 = arith.mulf %6, %30 : vector<8x512xf32>
    %34 = arith.addf %32, %33 : vector<8x512xf32>
    %35 = arith.mulf %9, %31 : vector<8x512xf32>
    %36 = arith.addf %34, %35 : vector<8x512xf32>
    %37 = arith.mulf %12, %29 : vector<8x512xf32>
    %38 = arith.mulf %15, %30 : vector<8x512xf32>
    %39 = arith.addf %37, %38 : vector<8x512xf32>
    %40 = arith.mulf %18, %31 : vector<8x512xf32>
    %41 = arith.addf %39, %40 : vector<8x512xf32>
    %42 = arith.mulf %21, %29 : vector<8x512xf32>
    %43 = arith.mulf %24, %30 : vector<8x512xf32>
    %44 = arith.addf %42, %43 : vector<8x512xf32>
    %45 = arith.mulf %27, %31 : vector<8x512xf32>
    %46 = arith.addf %44, %45 : vector<8x512xf32>
    %c32 = arith.constant 32 : index
    %c0_6 = arith.constant 0 : index
    %47 = vector.load %arg1[%c32, %c0_6] : memref<56x512xf32, #tpu.memory_space<vmem>>, vector<8x512xf32>
    %c40 = arith.constant 40 : index
    %c0_7 = arith.constant 0 : index
    %48 = vector.load %arg1[%c40, %c0_7] : memref<56x512xf32, #tpu.memory_space<vmem>>, vector<8x512xf32>
    %c48 = arith.constant 48 : index
    %c0_8 = arith.constant 0 : index
    %49 = vector.load %arg1[%c48, %c0_8] : memref<56x512xf32, #tpu.memory_space<vmem>>, vector<8x512xf32>
    %50 = arith.mulf %3, %47 : vector<8x512xf32>
    %51 = arith.mulf %6, %48 : vector<8x512xf32>
    %52 = arith.addf %50, %51 : vector<8x512xf32>
    %53 = arith.mulf %9, %49 : vector<8x512xf32>
    %54 = arith.addf %52, %53 : vector<8x512xf32>
    %55 = arith.mulf %12, %47 : vector<8x512xf32>
    %56 = arith.mulf %15, %48 : vector<8x512xf32>
    %57 = arith.addf %55, %56 : vector<8x512xf32>
    %58 = arith.mulf %18, %49 : vector<8x512xf32>
    %59 = arith.addf %57, %58 : vector<8x512xf32>
    %60 = arith.mulf %21, %47 : vector<8x512xf32>
    %61 = arith.mulf %24, %48 : vector<8x512xf32>
    %62 = arith.addf %60, %61 : vector<8x512xf32>
    %63 = arith.mulf %27, %49 : vector<8x512xf32>
    %64 = arith.addf %62, %63 : vector<8x512xf32>
    %65 = tpu.iota {dimensions = array<i32: 0>} : vector<8x512xi32>
    %c0_i32 = arith.constant 0 : i32
    %66 = vector.broadcast %c0_i32 : i32 to vector<8x512xi32>
    %67 = arith.cmpi eq, %65, %66 : vector<8x512xi32>
    %cst = arith.constant 1.000000e+00 : f32
    %cst_9 = arith.constant 0.000000e+00 : f32
    %68 = vector.broadcast %cst : f32 to vector<8x512xf32>
    %69 = vector.broadcast %cst_9 : f32 to vector<8x512xf32>
    %70 = arith.select %67, %68, %69 : vector<8x512xi1>, vector<8x512xf32>
    %71 = tpu.concatenate %28, %36, %41, %46, %54, %59, %64, %70 in 0 : vector<8x512xf32>, vector<8x512xf32>, vector<8x512xf32>, vector<8x512xf32>, vector<8x512xf32>, vector<8x512xf32>, vector<8x512xf32>, vector<8x512xf32> -> vector<64x512xf32>
    %c0_10 = arith.constant 0 : index
    %c0_11 = arith.constant 0 : index
    %72 = vector.load %arg3[%c0_10, %c0_11] : memref<56x64xf32, #tpu.memory_space<vmem>>, vector<56x64xf32>
    %cst_12 = arith.constant dense<0.000000e+00> : vector<56x512xf32>
    %73 = tpu.matmul %72, %71, %cst_12 {dimension_numbers = #tpu.dot_dimension_numbers<[1], [0], [0], [1], [0, 0, 1, 1], [], []>} : vector<56x64xf32>, vector<64x512xf32>, vector<56x512xf32> -> vector<56x512xf32>
    %74 = vector.extract_strided_slice %0 {offsets = [0, 0], sizes = [1, 512], strides = [1, 1]} : vector<16x512xf32> to vector<1x512xf32>
    %75 = vector.shape_cast %74 : vector<1x512xf32> to vector<1x512xf32>
    %76 = vector.broadcast %75 : vector<1x512xf32> to vector<8x512xf32>
    %77 = vector.extract_strided_slice %0 {offsets = [1, 0], sizes = [1, 512], strides = [1, 1]} : vector<16x512xf32> to vector<1x512xf32>
    %78 = vector.shape_cast %77 : vector<1x512xf32> to vector<1x512xf32>
    %79 = vector.broadcast %78 : vector<1x512xf32> to vector<8x512xf32>
    %80 = vector.extract_strided_slice %0 {offsets = [2, 0], sizes = [1, 512], strides = [1, 1]} : vector<16x512xf32> to vector<1x512xf32>
    %81 = vector.shape_cast %80 : vector<1x512xf32> to vector<1x512xf32>
    %82 = vector.broadcast %81 : vector<1x512xf32> to vector<8x512xf32>
    %83 = vector.extract_strided_slice %0 {offsets = [3, 0], sizes = [1, 512], strides = [1, 1]} : vector<16x512xf32> to vector<1x512xf32>
    %84 = vector.shape_cast %83 : vector<1x512xf32> to vector<1x512xf32>
    %85 = vector.broadcast %84 : vector<1x512xf32> to vector<8x512xf32>
    %86 = vector.extract_strided_slice %0 {offsets = [4, 0], sizes = [1, 512], strides = [1, 1]} : vector<16x512xf32> to vector<1x512xf32>
    %87 = vector.shape_cast %86 : vector<1x512xf32> to vector<1x512xf32>
    %88 = vector.broadcast %87 : vector<1x512xf32> to vector<8x512xf32>
    %89 = vector.extract_strided_slice %0 {offsets = [5, 0], sizes = [1, 512], strides = [1, 1]} : vector<16x512xf32> to vector<1x512xf32>
    %90 = vector.shape_cast %89 : vector<1x512xf32> to vector<1x512xf32>
    %91 = vector.broadcast %90 : vector<1x512xf32> to vector<8x512xf32>
    %92 = vector.extract_strided_slice %0 {offsets = [6, 0], sizes = [1, 512], strides = [1, 1]} : vector<16x512xf32> to vector<1x512xf32>
    %93 = vector.shape_cast %92 : vector<1x512xf32> to vector<1x512xf32>
    %94 = vector.broadcast %93 : vector<1x512xf32> to vector<8x512xf32>
    %95 = vector.extract_strided_slice %0 {offsets = [7, 0], sizes = [1, 512], strides = [1, 1]} : vector<16x512xf32> to vector<1x512xf32>
    %96 = vector.shape_cast %95 : vector<1x512xf32> to vector<1x512xf32>
    %97 = vector.broadcast %96 : vector<1x512xf32> to vector<8x512xf32>
    %98 = vector.extract_strided_slice %0 {offsets = [8, 0], sizes = [1, 512], strides = [1, 1]} : vector<16x512xf32> to vector<1x512xf32>
    %99 = vector.shape_cast %98 : vector<1x512xf32> to vector<1x512xf32>
    %100 = vector.broadcast %99 : vector<1x512xf32> to vector<8x512xf32>
    %101 = vector.extract_strided_slice %73 {offsets = [0, 0], sizes = [8, 512], strides = [1, 1]} : vector<56x512xf32> to vector<8x512xf32>
    %c0_13 = arith.constant 0 : index
    %c0_14 = arith.constant 0 : index
    %102 = vector.load %arg4[%c0_13, %c0_14] : memref<56x512xf32, #tpu.memory_space<vmem>>, vector<8x512xf32>
    tpu.vector_store %arg4[%c0_13, %c0_14], %101 {strides = array<i32>} : memref<56x512xf32, #tpu.memory_space<vmem>>, vector<8x512xf32>,
    %103 = vector.extract_strided_slice %73 {offsets = [8, 0], sizes = [8, 512], strides = [1, 1]} : vector<56x512xf32> to vector<8x512xf32>
    %104 = vector.extract_strided_slice %73 {offsets = [16, 0], sizes = [8, 512], strides = [1, 1]} : vector<56x512xf32> to vector<8x512xf32>
    %105 = vector.extract_strided_slice %73 {offsets = [24, 0], sizes = [8, 512], strides = [1, 1]} : vector<56x512xf32> to vector<8x512xf32>
    %106 = arith.mulf %76, %103 : vector<8x512xf32>
    %107 = arith.mulf %85, %104 : vector<8x512xf32>
    %108 = arith.addf %106, %107 : vector<8x512xf32>
    %109 = arith.mulf %94, %105 : vector<8x512xf32>
    %110 = arith.addf %108, %109 : vector<8x512xf32>
    %c8_15 = arith.constant 8 : index
    %c0_16 = arith.constant 0 : index
    %111 = vector.load %arg4[%c8_15, %c0_16] : memref<56x512xf32, #tpu.memory_space<vmem>>, vector<8x512xf32>
    tpu.vector_store %arg4[%c8_15, %c0_16], %110 {strides = array<i32>} : memref<56x512xf32, #tpu.memory_space<vmem>>, vector<8x512xf32>,
    %112 = arith.mulf %79, %103 : vector<8x512xf32>
    %113 = arith.mulf %88, %104 : vector<8x512xf32>
    %114 = arith.addf %112, %113 : vector<8x512xf32>
    %115 = arith.mulf %97, %105 : vector<8x512xf32>
    %116 = arith.addf %114, %115 : vector<8x512xf32>
    %c16_17 = arith.constant 16 : index
    %c0_18 = arith.constant 0 : index
    %117 = vector.load %arg4[%c16_17, %c0_18] : memref<56x512xf32, #tpu.memory_space<vmem>>, vector<8x512xf32>
    tpu.vector_store %arg4[%c16_17, %c0_18], %116 {strides = array<i32>} : memref<56x512xf32, #tpu.memory_space<vmem>>, vector<8x512xf32>,
    %118 = arith.mulf %82, %103 : vector<8x512xf32>
    %119 = arith.mulf %91, %104 : vector<8x512xf32>
    %120 = arith.addf %118, %119 : vector<8x512xf32>
    %121 = arith.mulf %100, %105 : vector<8x512xf32>
    %122 = arith.addf %120, %121 : vector<8x512xf32>
    %c24_19 = arith.constant 24 : index
    %c0_20 = arith.constant 0 : index
    %123 = vector.load %arg4[%c24_19, %c0_20] : memref<56x512xf32, #tpu.memory_space<vmem>>, vector<8x512xf32>
    tpu.vector_store %arg4[%c24_19, %c0_20], %122 {strides = array<i32>} : memref<56x512xf32, #tpu.memory_space<vmem>>, vector<8x512xf32>,
    %124 = vector.extract_strided_slice %73 {offsets = [32, 0], sizes = [8, 512], strides = [1, 1]} : vector<56x512xf32> to vector<8x512xf32>
    %125 = vector.extract_strided_slice %73 {offsets = [40, 0], sizes = [8, 512], strides = [1, 1]} : vector<56x512xf32> to vector<8x512xf32>
    %126 = vector.extract_strided_slice %73 {offsets = [48, 0], sizes = [8, 512], strides = [1, 1]} : vector<56x512xf32> to vector<8x512xf32>
    %127 = arith.mulf %76, %124 : vector<8x512xf32>
    %128 = arith.mulf %85, %125 : vector<8x512xf32>
    %129 = arith.addf %127, %128 : vector<8x512xf32>
    %130 = arith.mulf %94, %126 : vector<8x512xf32>
    %131 = arith.addf %129, %130 : vector<8x512xf32>
    %c32_21 = arith.constant 32 : index
    %c0_22 = arith.constant 0 : index
    %132 = vector.load %arg4[%c32_21, %c0_22] : memref<56x512xf32, #tpu.memory_space<vmem>>, vector<8x512xf32>
    tpu.vector_store %arg4[%c32_21, %c0_22], %131 {strides = array<i32>} : memref<56x512xf32, #tpu.memory_space<vmem>>, vector<8x512xf32>,
    %133 = arith.mulf %79, %124 : vector<8x512xf32>
    %134 = arith.mulf %88, %125 : vector<8x512xf32>
    %135 = arith.addf %133, %134 : vector<8x512xf32>
    %136 = arith.mulf %97, %126 : vector<8x512xf32>
    %137 = arith.addf %135, %136 : vector<8x512xf32>
    %c40_23 = arith.constant 40 : index
    %c0_24 = arith.constant 0 : index
    %138 = vector.load %arg4[%c40_23, %c0_24] : memref<56x512xf32, #tpu.memory_space<vmem>>, vector<8x512xf32>
    tpu.vector_store %arg4[%c40_23, %c0_24], %137 {strides = array<i32>} : memref<56x512xf32, #tpu.memory_space<vmem>>, vector<8x512xf32>,
    %139 = arith.mulf %82, %124 : vector<8x512xf32>
    %140 = arith.mulf %91, %125 : vector<8x512xf32>
    %141 = arith.addf %139, %140 : vector<8x512xf32>
    %142 = arith.mulf %100, %126 : vector<8x512xf32>
    %143 = arith.addf %141, %142 : vector<8x512xf32>
    %c48_25 = arith.constant 48 : index
    %c0_26 = arith.constant 0 : index
    %144 = vector.load %arg4[%c48_25, %c0_26] : memref<56x512xf32, #tpu.memory_space<vmem>>, vector<8x512xf32>
    tpu.vector_store %arg4[%c48_25, %c0_26], %143 {strides = array<i32>} : memref<56x512xf32, #tpu.memory_space<vmem>>, vector<8x512xf32>,
    return
  }
  func.func @transform_0(%arg0: i32) -> (i32, i32) {
    %c0_i32 = arith.constant 0 : i32
    %c0_i32_0 = arith.constant 0 : i32
    return %c0_i32, %arg0 : i32, i32
  }
  func.func @transform_1(%arg0: i32) -> (i32, i32) {
    %c0_i32 = arith.constant 0 : i32
    %c0_i32_0 = arith.constant 0 : i32
    return %c0_i32, %arg0 : i32, i32
  }
  func.func @transform_2(%arg0: i32) -> (i32, i32) {
    %c0_i32 = arith.constant 0 : i32
    %c0_i32_0 = arith.constant 0 : i32
    %c0_i32_1 = arith.constant 0 : i32
    return %c0_i32, %c0_i32_0 : i32, i32
  }
  func.func @transform_3(%arg0: i32) -> (i32, i32) {
    %c0_i32 = arith.constant 0 : i32
    %c0_i32_0 = arith.constant 0 : i32
    return %c0_i32, %arg0 : i32, i32
  }
}

</mosaic_0001>

<bundles_post_ra>
// kernel: fwd.1
= control target key start
LH: loop header
LB: loop body
LE: loop exit
PB: predicated region body
PF: predicated region fallthrough
CT: control target
= control target key end

     0   :  { %s1256_s12 = smov 0   ;;  %s1258_s13 = smov 0   ;;  %s1989_s0 = inlined_call_operand.vmem [shape: f32[56,1024], index: 0, kind: input, shape index: {}]   ;;  %s1990_s1 = inlined_call_operand.vmem [shape: f32[16,1024], index: 1, kind: input, shape index: {}]   ;;  %s1991_s2 = inlined_call_operand.vmem [shape: f32[56,64], index: 2, kind: input, shape index: {}]   ;;  %s1992_s3 = inlined_call_operand.vmem [shape: f32[56,1024], index: 3, kind: output, shape index: {}]  }
   0x1   :  { %s1260_s14 = smov 0  }
   0x2 LB: > { %s1146_s15 = sadd.s32 4294967295, %s1232_s14   ;;  %s1273_s16 = sadd.s32 1, %s1232_s14   ;;  %s1232_s14 = sphi %s1260_s14, %s2024_s14   ;;  %s1228_s13 = sphi %s1258_s13, %s2023_s13   ;;  %s1224_s12 = sphi %s1256_s12, %s2022_s12  }
   0x3   : > { %s17_s17 = ssub.s32 %s1232_s14, %s1273_s16  ;;  %s20_s18 = sadd.s32 1, %s1228_s13 }
   0x4   : > { %p18_p0 = scmp.eq.s32.totalorder %s17_s17, 0  ;;  %p27_p1 = scmp.ne.s32.totalorder %s1228_s13, %s1224_s12 }
   0x5   : > { %p28_p2 = scmp.eq.s32.totalorder %s1232_s14, 0  ;;  %p104_p3 = scmp.eq.s32.totalorder %s1146_s15, 1 }
   0x6   : > { %s1284_s19 = scalar_select %p18_p0, %s1228_s13, %s20_s18  }
   0x7   : > { %p1286_p4 = por %p28_p2, %p27_p1  ;;  %p1290_p5 = por %p104_p3, %p27_p1 }
   0x8   : > { %p1149_p6 = scmp.ge.s32.totalorder %s1232_s14, 2 }
   0xa   : > { %129 = sbr.rel (%p1149_p6) target bundleno = 42 (0x2a), region = 20 }
   0xf   : > { %132 = sbr.rel (!%p1286_p4) target bundleno = 34 (0x22), region = 24  ;;  %s134_s22 = sand.u32 (%p1286_p4), 1, %s1228_s13  }
  0x10   : > { %s1179_s23 = sshll.u32 (%p1286_p4), %s1232_s14, 5  ;;  %s1182_s24 = smul.u32 (%p1286_p4), 224, %s134_s22 }
  0x11   : > { %s1302_s27 = scalar_lea.vmem (%p1286_p4), %s1989_s0, %s1179_s23 }
  0x12   : > { %v152_v0 = vld [vmem:[%s1302_s27] sm:$0xff] (%p1286_p4)  ;;  %v154_v1 = vld [vmem:[%s1302_s27 + $0x8] sm:$0xff] (%p1286_p4)  ;;  %v156_v2 = vld [vmem:[%s1302_s27 + $0x10] sm:$0xff] (%p1286_p4)  ;;  %s1310_s28 = scalar_lea.vmem (%p1286_p4), [#allocation2], %s1182_s24 }
  0x13   : > { %v158_v3 = vld [vmem:[%s1302_s27 + $0x18] sm:$0xff] (%p1286_p4)  ;;  %v160_v4 = vld [vmem:[%s1302_s27 + $0x40] sm:$0xff] (%p1286_p4)  ;;  %v162_v5 = vld [vmem:[%s1302_s27 + $0x48] sm:$0xff] (%p1286_p4)  ;;  %153 = vst [vmem:[%s1310_s28] sm:$0xff] (%p1286_p4), %v152_v0 }
  0x14   : > { %155 = vst [vmem:[%s1310_s28 + $0x8] sm:$0xff] %v154_v1  ;;  %157 = vst [vmem:[%s1310_s28 + $0x10] sm:$0xff] %v156_v2  ;;  %v164_v6 = vld [vmem:[%s1302_s27 + $0x50] sm:$0xff]  ;;  %v166_v7 = vld [vmem:[%s1302_s27 + $0x58] sm:$0xff] }
  0x15   : > { %159 = vst [vmem:[%s1310_s28 + $0x18] sm:$0xff] %v158_v3  ;;  %161 = vst [vmem:[%s1310_s28 + $0x20] sm:$0xff] %v160_v4  ;;  %v168_v8 = vld [vmem:[%s1302_s27 + $0x80] sm:$0xff]  ;;  %v170_v9 = vld [vmem:[%s1302_s27 + $0x88] sm:$0xff] }
  0x16   : > { %163 = vst [vmem:[%s1310_s28 + $0x28] sm:$0xff] %v162_v5  ;;  %165 = vst [vmem:[%s1310_s28 + $0x30] sm:$0xff] %v164_v6  ;;  %v172_v10 = vld [vmem:[%s1302_s27 + $0x90] sm:$0xff]  ;;  %v174_v11 = vld [vmem:[%s1302_s27 + $0x98] sm:$0xff] }
  0x17   : > { %167 = vst [vmem:[%s1310_s28 + $0x38] sm:$0xff] %v166_v7  ;;  %169 = vst [vmem:[%s1310_s28 + $0x40] sm:$0xff] %v168_v8  ;;  %v176_v12 = vld [vmem:[%s1302_s27 + $0xc0] sm:$0xff]  ;;  %v178_v13 = vld [vmem:[%s1302_s27 + $0xc8] sm:$0xff] }
  0x18   : > { %171 = vst [vmem:[%s1310_s28 + $0x48] sm:$0xff] %v170_v9  ;;  %173 = vst [vmem:[%s1310_s28 + $0x50] sm:$0xff] %v172_v10  ;;  %v180_v14 = vld [vmem:[%s1302_s27 + $0xd0] sm:$0xff]  ;;  %v182_v15 = vld [vmem:[%s1302_s27 + $0xd8] sm:$0xff] }
  0x19   : > { %175 = vst [vmem:[%s1310_s28 + $0x58] sm:$0xff] %v174_v11  ;;  %177 = vst [vmem:[%s1310_s28 + $0x60] sm:$0xff] %v176_v12  ;;  %v184_v16 = vld [vmem:[%s1302_s27 + $0x100] sm:$0xff]  ;;  %v186_v17 = vld [vmem:[%s1302_s27 + $0x108] sm:$0xff] }
  0x1a   : > { %179 = vst [vmem:[%s1310_s28 + $0x68] sm:$0xff] %v178_v13  ;;  %181 = vst [vmem:[%s1310_s28 + $0x70] sm:$0xff] %v180_v14  ;;  %v188_v18 = vld [vmem:[%s1302_s27 + $0x110] sm:$0xff]  ;;  %v190_v19 = vld [vmem:[%s1302_s27 + $0x118] sm:$0xff] }
  0x1b   : > { %183 = vst [vmem:[%s1310_s28 + $0x78] sm:$0xff] %v182_v15  ;;  %185 = vst [vmem:[%s1310_s28 + $0x80] sm:$0xff] %v184_v16  ;;  %v192_v20 = vld [vmem:[%s1302_s27 + $0x140] sm:$0xff]  ;;  %v194_v21 = vld [vmem:[%s1302_s27 + $0x148] sm:$0xff] }
  0x1c   : > { %187 = vst [vmem:[%s1310_s28 + $0x88] sm:$0xff] %v186_v17  ;;  %189 = vst [vmem:[%s1310_s28 + $0x90] sm:$0xff] %v188_v18  ;;  %v196_v22 = vld [vmem:[%s1302_s27 + $0x150] sm:$0xff]  ;;  %v198_v23 = vld [vmem:[%s1302_s27 + $0x158] sm:$0xff] }
  0x1d   : > { %191 = vst [vmem:[%s1310_s28 + $0x98] sm:$0xff] %v190_v19  ;;  %193 = vst [vmem:[%s1310_s28 + $0xa0] sm:$0xff] %v192_v20  ;;  %v200_v24 = vld [vmem:[%s1302_s27 + $0x180] sm:$0xff]  ;;  %v202_v25 = vld [vmem:[%s1302_s27 + $0x188] sm:$0xff] }
  0x1e   : > { %195 = vst [vmem:[%s1310_s28 + $0xa8] sm:$0xff] %v194_v21  ;;  %197 = vst [vmem:[%s1310_s28 + $0xb0] sm:$0xff] %v196_v22  ;;  %v204_v26 = vld [vmem:[%s1302_s27 + $0x190] sm:$0xff]  ;;  %v206_v27 = vld [vmem:[%s1302_s27 + $0x198] sm:$0xff] }
  0x1f   : > { %199 = vst [vmem:[%s1310_s28 + $0xb8] sm:$0xff] %v198_v23  ;;  %201 = vst [vmem:[%s1310_s28 + $0xc0] sm:$0xff] %v200_v24 }
  0x20   : > { %203 = vst [vmem:[%s1310_s28 + $0xc8] sm:$0xff] %v202_v25  ;;  %205 = vst [vmem:[%s1310_s28 + $0xd0] sm:$0xff] %v204_v26 }
  0x21   : > { %207 = vst [vmem:[%s1310_s28 + $0xd8] sm:$0xff] %v206_v27 }
  0x22 PF: > { %213 = sbr.rel (!%p1286_p4) target bundleno = 42 (0x2a), region = 47  ;;  %s215_s29 = sand.u32 (%p1286_p4), 1, %s1228_s13  }
  0x23   : > { %s1180_s30 = sshll.u32 (%p1286_p4), %s1232_s14, 5  ;;  %s1152_s4 = sshll.u32 (%p1286_p4), %s215_s29, 6 }
  0x24   : > { %s220_s7 = scalar_lea.vmem (%p1286_p4), %s1990_s1, %s1180_s30  ;;  %s217_s8 = scalar_lea.vmem (%p1286_p4), [#allocation3], %s1152_s4 }
  0x25   : > { %v233_v28 = vld [vmem:[%s220_s7] sm:$0xff] (%p1286_p4)  ;;  %v235_v29 = vld [vmem:[%s220_s7 + $0x8] sm:$0xff] (%p1286_p4)  ;;  %v237_v30 = vld [vmem:[%s220_s7 + $0x10] sm:$0xff] (%p1286_p4) }
  0x26   : > { %234 = vst [vmem:[%s217_s8] sm:$0xff] (%p1286_p4), %v233_v28  ;;  %236 = vst [vmem:[%s217_s8 + $0x8] sm:$0xff] (%p1286_p4), %v235_v29  ;;  %v239_v31 = vld [vmem:[%s220_s7 + $0x18] sm:$0xff] (%p1286_p4)  ;;  %v241_v32 = vld [vmem:[%s220_s7 + $0x40] sm:$0xff] (%p1286_p4) }
  0x27   : > { %238 = vst [vmem:[%s217_s8 + $0x10] sm:$0xff] %v237_v30  ;;  %v243_v33 = vld [vmem:[%s220_s7 + $0x48] sm:$0xff]  ;;  %240 = vst [vmem:[%s217_s8 + $0x18] sm:$0xff] %v239_v31  ;;  %v245_v34 = vld [vmem:[%s220_s7 + $0x50] sm:$0xff] }
  0x28   : > { %242 = vst [vmem:[%s217_s8 + $0x20] sm:$0xff] %v241_v32  ;;  %244 = vst [vmem:[%s217_s8 + $0x28] sm:$0xff] %v243_v33  ;;  %v247_v35 = vld [vmem:[%s220_s7 + $0x58] sm:$0xff] }
  0x29   : > { %246 = vst [vmem:[%s217_s8 + $0x30] sm:$0xff] %v245_v34  ;;  %248 = vst [vmem:[%s217_s8 + $0x38] sm:$0xff] %v247_v35 }
  0x2a PF: > { %p1155_p7 = scmp.ge.s32.totalorder %s1232_s14, 1  ;;  %p253_p8 = scmp.lt.s32.totalorder %s1232_s14, 3 }
  0x2c   : > { %p254_p9 = pnand %p1155_p7, %p253_p8 }
  0x2e   : > { %257 = sbr.rel (%p254_p9) target bundleno = 347 (0x15b), region = 70 }
  0x33   : > { %v304_v36 = vlaneseq  ;;  %s260_s9 = sand.u32 1, %s1224_s12   ;;  %v1993_v37 = vmov 0.0   ;;  %v1235_v47 = vmov 1.0   ;;  %vm607_vm1 = vcmask 523264   ;;  %s1181_s8 = sshll.u32 (%p1290_p5), %s1146_s15, 5 }
  0x34   : > { %s1372_s10 = smul.u32 224, %s260_s9  ;;  %s1156_s11 = sshll.u32 %s260_s9, 6  ;;  %693 = vmatprep.mubr.f32.mxu0 %v1993_v37  ;;  %800 = vmatprep.mubr.f32.mxu1 %v1993_v37 }
  0x35   : > { %v1376_v38 = vshrl.u32 %v304_v36, 7  ;;  %s1378_s17 = scalar_lea.vmem [#allocation3], %s1156_s11  ;;  %s1924_s21 = scalar_lea.vmem (%p1290_p5), %s1992_s3, %s1181_s8 }
  0x36   : > { %v1381_v39 = vld [vmem:[%s1378_s17 + $0x8] sm:$0xff]  ;;  %v1385_v41 = vld [vmem:[%s1378_s17 + $0x18] sm:$0xff]  ;;  %s1394_s12 = scalar_lea.vmem [#allocation2], %s1372_s10  ;;  %v1442_v59 = vld [vmem:[%s1378_s17] sm:$0xff]  ;;  %s1812_s7 = scalar_lea.vmem [#allocation4], %s1372_s10 }
  0x37   : > { %v301_v40 = vld [vmem:[%s1378_s17 + $0x28] sm:$0xff]  ;;  %vm598_vm0 = vcmp.eq.s32.totalorder %v1376_v38, 0  ;;  %v1389_v42 = vsub.s32 0, %v1376_v38  ;;  %v402_v43 = vsub.s32 6, %v1376_v38  ;;  %v418_v44 = vsub.s32 7, %v1376_v38  ;;  %v303_v49 = vld [vmem:[%s1378_s17 + $0x38] sm:$0xff] }
  0x38   : > { %v1397_v45 = vld [vmem:[%s1394_s12 + $0x88] sm:$0xff]  ;;  %1157 = vmatprep.subr.msk.mxu0 %vm598_vm0, %v1235_v47  ;;  %1166 = vmatprep.subr.msk.mxu1 %vm598_vm0, %v1235_v47  ;;  %v1411_v50 = vld [vmem:[%s1394_s12 + $0x98] sm:$0xff]  ;;  %v1414_v51 = vsub.s32 3, %v1376_v38  ;;  %v1417_v52 = vsub.s32 4, %v1376_v38  ;;  %v1420_v53 = vsub.s32 5, %v1376_v38  ;;  %v1445_v60 = vsub.s32 1, %v1376_v38 }
  0x39   : > { %v1400_v46 = vld [vmem:[%s1394_s12 + $0xa8] sm:$0xff]  ;;  %1158 = vmatpush1.msk.msra.mxu0 %vm598_vm0, %v1235_v47  ;;  %1167 = vmatpush1.msk.msra.mxu1 %vm598_vm0, %v1235_v47  ;;  %v1427_v54 = vrot.slane %v1381_v39, %v402_v43  ;;  %v1430_v55 = vrot.slane %v1381_v39, %v418_v44  ;;  %v1433_v56 = vrot.slane %v301_v40, %v1389_v42  ;;  %v1436_v57 = vld [vmem:[%s1394_s12 + $0xb8] sm:$0xff]  ;;  %v300_v0 = vld [vmem:[%s1378_s17 + $0x20] sm:$0xff] }
  0x3a   : > { %v1407_v48 = vld [vmem:[%s1394_s12 + $0xc8] sm:$0xff]  ;;  %v1439_v58 = vld [vmem:[%s1394_s12 + $0xd8] sm:$0xff]  ;;  %v1448_v61 = vrot.slane %v1385_v41, %v402_v43  ;;  %v1451_v62 = vrot.slane %v1385_v41, %v418_v44  ;;  %v1454_v63 = vrot.slane %v303_v49, %v1389_v42  ;;  %v1458_v1 = vrot.slane %v1442_v59, %v402_v43  ;;  %v1461_v2 = vld [vmem:[%s1394_s12 + $0x80] sm:$0xff] }
  0x3b   : > { %2008 = vst [vmem:[#allocation5_spill] sm:$0xff] %v1430_v55  ;;  %2009 = vst [vmem:[#allocation6_spill] sm:$0xff] %v1433_v56  ;;  %v1464_v3 = vld [vmem:[%s1394_s12 + $0xa0] sm:$0xff]  ;;  %v577_v4 = vmul.f32 %v1397_v45, %v1427_v54  ;;  %v581_v5 = vmul.f32 %v1400_v46, %v1430_v55  ;;  %v589_v6 = vmul.f32 %v1407_v48, %v1433_v56  ;;  %v1479_v9 = vld [vmem:[%s1378_s17 + $0x10] sm:$0xff] }
  0x3c   : > { %2010 = vst [vmem:[#allocation7_spill] sm:$0xff] %v1448_v61  ;;  %2011 = vst [vmem:[#allocation8_spill] sm:$0xff] %v1451_v62  ;;  %v1473_v7 = vrot.slane %v1442_v59, %v418_v44  ;;  %v1476_v8 = vld [vmem:[%s1394_s12 + $0xc0] sm:$0xff]  ;;  %v302_v10 = vld [vmem:[%s1378_s17 + $0x30] sm:$0xff]  ;;  %v579_v11 = vmul.f32 %v1411_v50, %v1448_v61  ;;  %v583_v12 = vmul.f32 %v1436_v57, %v1451_v62 }
  0x3d   : > { %2012 = vst [vmem:[#allocation9_spill] sm:$0xff] %v1454_v63  ;;  %v591_v13 = vmul.f32 %v1439_v58, %v1454_v63  ;;  %v1489_v14 = vrot.slane %v300_v0, %v1389_v42  ;;  %v1492_v15 = vld [vmem:[%s1394_s12 + $0x90] sm:$0xff]  ;;  %v585_v16 = vadd.f32 %v581_v5, %v577_v4  ;;  %v576_v17 = vmul.f32 %v1461_v2, %v1458_v1 }
  0x3e   : > { %v580_v18 = vmul.f32 %v1464_v3, %v1473_v7  ;;  %v1499_v19 = vrot.slane %v1479_v9, %v402_v43  ;;  %v1502_v20 = vld [vmem:[%s1394_s12 + $0xb0] sm:$0xff]  ;;  %v587_v22 = vadd.f32 %v583_v12, %v579_v11  ;;  %v1510_v24 = vrot.slane %v1479_v9, %v418_v44 }
  0x3f   : > { %v1505_v21 = vld [vmem:[%s1394_s12 + $0xd0] sm:$0xff]  ;;  %v588_v23 = vmul.f32 %v1476_v8, %v1489_v14  ;;  %v1513_v25 = vrot.slane %v302_v10, %v1389_v42  ;;  %v593_v26 = vadd.f32 %v589_v6, %v585_v16  ;;  %v1519_v29 = vrot.slane %v1381_v39, %v1414_v51 }
  0x40   : > { %v584_v27 = vadd.f32 %v580_v18, %v576_v17  ;;  %v578_v28 = vmul.f32 %v1492_v15, %v1499_v19  ;;  %v595_v30 = vadd.f32 %v591_v13, %v587_v22  ;;  %v582_v31 = vmul.f32 %v1502_v20, %v1510_v24 }
  0x41   : > { %v590_v32 = vmul.f32 %v1505_v21, %v1513_v25  ;;  %v1527_v33 = vrot.slane %v1381_v39, %v1417_v52  ;;  %647 = vmatprep.subr.mxu0 %v593_v26  ;;  %v1531_v35 = vrot.slane %v1381_v39, %v1420_v53  ;;  %v557_v36 = vmul.f32 %v1397_v45, %v1519_v29 }
  0x42   : > { %v592_v34 = vadd.f32 %v588_v23, %v584_v27  ;;  %v1537_v40 = vrot.slane %v1385_v41, %v1414_v51  ;;  %754 = vmatprep.subr.mxu1 %v595_v30  ;;  %v586_v43 = vadd.f32 %v582_v31, %v578_v28  ;;  %v1543_v47 = vrot.slane %v1385_v41, %v1417_v52 }
  0x43   : > { %v561_v44 = vmul.f32 %v1400_v46, %v1527_v33  ;;  %v1547_v49 = vrot.slane %v1385_v41, %v1420_v53  ;;  %v569_v0 = vmul.f32 %v1407_v48, %v1531_v35  ;;  %v1555_v5 = vrot.slane %v1442_v59, %v1414_v51 }
  0x44   : > { %648 = vmatpush1.msra.mxu0 %v592_v34  ;;  %v559_v4 = vmul.f32 %v1411_v50, %v1537_v40  ;;  %v1559_v6 = vrot.slane %v1442_v59, %v1417_v52  ;;  %v594_v10 = vadd.f32 %v590_v32, %v586_v43  ;;  %v563_v12 = vmul.f32 %v1436_v57, %v1543_v47 }
  0x45   : > { %v565_v11 = vadd.f32 %v561_v44, %v557_v36  ;;  %v571_v13 = vmul.f32 %v1439_v58, %v1547_v49  ;;  %v1567_v16 = vrot.slane %v1442_v59, %v1420_v53  ;;  %v556_v17 = vmul.f32 %v1461_v2, %v1555_v5 }
  0x46   : > { %v560_v18 = vmul.f32 %v1464_v3, %v1559_v6  ;;  %v1575_v22 = vrot.slane %v1479_v9, %v1414_v51  ;;  %755 = vmatpush1.msra.mxu1 %v594_v10  ;;  %v567_v26 = vadd.f32 %v563_v12, %v559_v4  ;;  %v1579_v27 = vrot.slane %v1479_v9, %v1417_v52 }
  0x47   : > { %v573_v23 = vadd.f32 %v569_v0, %v565_v11  ;;  %v1583_v28 = vrot.slane %v1479_v9, %v1420_v53  ;;  %v568_v31 = vmul.f32 %v1476_v8, %v1567_v16  ;;  %v1591_v51 = vrot.slane %v1381_v39, %v1389_v42 }
  0x48   : > { %v564_v30 = vadd.f32 %v560_v18, %v556_v17  ;;  %v558_v32 = vmul.f32 %v1492_v15, %v1575_v22  ;;  %v575_v34 = vadd.f32 %v571_v13, %v567_v26  ;;  %v562_v52 = vmul.f32 %v1502_v20, %v1579_v27 }
  0x49   : > { %2013 = vst [vmem:[#allocation10_spill] sm:$0xff] %v1583_v28  ;;  %649 = vmatprep.subr.mxu0 %v573_v23  ;;  %v570_v53 = vmul.f32 %v1505_v21, %v1583_v28  ;;  %v1599_v36 = vrot.slane %v1381_v39, %v1445_v60  ;;  %v338_v44 = vsub.s32 2, %v1376_v38  ;;  %v537_v0 = vmul.f32 %v1397_v45, %v1591_v51 }
  0x4a   : > { %v572_v43 = vadd.f32 %v568_v31, %v564_v30  ;;  %v1606_v4 = vrot.slane %v1385_v41, %v1389_v42  ;;  %756 = vmatprep.subr.mxu1 %v575_v34  ;;  %v566_v10 = vadd.f32 %v562_v52, %v558_v32  ;;  %v1612_v12 = vrot.slane %v1385_v41, %v1445_v60  ;;  %v1636_v30 = vld [vmem:[%s1394_s12 + $0x28] sm:$0xff] }
  0x4b   : > { %v541_v11 = vmul.f32 %v1400_v46, %v1599_v36  ;;  %v1616_v38 = vrot.slane %v1442_v59, %v1389_v42  ;;  %v1619_v45 = vrot.slane %v1381_v39, %v338_v44  ;;  %v1622_v13 = vrot.slane %v1385_v41, %v338_v44  ;;  %v1647_v32 = vld [vmem:[%s1394_s12 + $0x48] sm:$0xff] }
  0x4c   : > { %650 = vmatpush1.msra.mxu0 %v572_v43  ;;  %v539_v17 = vmul.f32 %v1411_v50, %v1606_v4  ;;  %v1628_v46 = vrot.slane %v1442_v59, %v1445_v60  ;;  %v574_v18 = vadd.f32 %v570_v53, %v566_v10  ;;  %v543_v26 = vmul.f32 %v1436_v57, %v1612_v12 }
  0x4d   : > { %v545_v23 = vadd.f32 %v541_v11, %v537_v0  ;;  %v1633_v39 = vrot.slane %v1442_v59, %v338_v44  ;;  %v549_v41 = vmul.f32 %v1407_v48, %v1619_v45  ;;  %v551_v50 = vmul.f32 %v1439_v58, %v1622_v13  ;;  %v1674_v0 = vld [vmem:[%s1394_s12 + $0x78] sm:$0xff] }
  0x4e   : > { %v536_v31 = vmul.f32 %v1461_v2, %v1616_v38  ;;  %v540_v57 = vmul.f32 %v1464_v3, %v1628_v46  ;;  %757 = vmatpush1.msra.mxu1 %v574_v18  ;;  %v547_v59 = vadd.f32 %v543_v26, %v539_v17  ;;  %v1653_v48 = vrot.slane %v1479_v9, %v1389_v42  ;;  %v1660_v2 = vld [vmem:[%s1394_s12 + $0x68] sm:$0xff]  ;;  %v1663_v3 = vld [vmem:[%s1394_s12 + $0x38] sm:$0xff]  ;;  %v1689_v18 = vld [vmem:[%s1394_s12 + $0x60] sm:$0xff] }
  0x4f   : > { %v548_v34 = vmul.f32 %v1476_v8, %v1633_v39  ;;  %v1657_v58 = vrot.slane %v1479_v9, %v1445_v60  ;;  %v553_v52 = vadd.f32 %v549_v41, %v545_v23  ;;  %v1666_v43 = vrot.slane %v1479_v9, %v338_v44  ;;  %v1671_v42 = vld [vmem:[%s1394_s12 + $0x58] sm:$0xff]  ;;  %v1677_v60 = vld [vmem:[%s1394_s12 + $0x20] sm:$0xff]  ;;  %v1692_v23 = vld [vmem:[%s1394_s12 + $0x30] sm:$0xff] }
  0x50   : > { %v544_v53 = vadd.f32 %v540_v57, %v536_v31  ;;  %v505_v8 = vmul.f32 %v1636_v30, %v1427_v54  ;;  %v555_v10 = vadd.f32 %v551_v50, %v547_v59  ;;  %v538_v11 = vmul.f32 %v1492_v15, %v1653_v48  ;;  %v1686_v44 = vld [vmem:[%s1394_s12 + $0x40] sm:$0xff]  ;;  %v458_v50 = vld [vmem:[%s1394_s12 + $0x50] sm:$0xff] }
  0x51   : > { %v542_v17 = vmul.f32 %v1502_v20, %v1657_v58  ;;  %v509_v9 = vmul.f32 %v1647_v32, %v1430_v55  ;;  %651 = vmatprep.subr.mxu0 %v553_v52  ;;  %v550_v41 = vmul.f32 %v1505_v21, %v1666_v43  ;;  %v517_v15 = vmul.f32 %v1660_v2, %v1433_v56 }
  0x52   : > { %v552_v26 = vadd.f32 %v548_v34, %v544_v53  ;;  %v507_v20 = vmul.f32 %v1663_v3, %v1448_v61  ;;  %758 = vmatprep.subr.mxu1 %v555_v10  ;;  %v511_v59 = vmul.f32 %v1671_v42, %v1451_v62  ;;  %v519_v52 = vmul.f32 %v1674_v0, %v1454_v63  ;;  %v462_v34 = vld [vmem:[%s1394_s12 + $0x70] sm:$0xff] }
  0x53   : > { %v546_v31 = vadd.f32 %v542_v17, %v538_v11  ;;  %v513_v57 = vadd.f32 %v509_v9, %v505_v8  ;;  %v504_v21 = vmul.f32 %v1677_v60, %v1458_v1  ;;  %v508_v53 = vmul.f32 %v1686_v44, %v1473_v7 }
  0x54   : > { %652 = vmatpush1.msra.mxu0 %v552_v26  ;;  %v516_v37 = vmul.f32 %v1689_v18, %v1489_v14  ;;  %v506_v8 = vmul.f32 %v1692_v23, %v1499_v19  ;;  %v515_v17 = vadd.f32 %v511_v59, %v507_v20  ;;  %v510_v9 = vmul.f32 %v458_v50, %v1510_v24 }
  0x55   : > { %v554_v10 = vadd.f32 %v550_v41, %v546_v31  ;;  %v521_v11 = vadd.f32 %v517_v15, %v513_v57  ;;  %v512_v63 = vadd.f32 %v508_v53, %v504_v21  ;;  %v518_v26 = vmul.f32 %v462_v34, %v1513_v25 }
  0x56   : > { %v485_v62 = vmul.f32 %v1636_v30, %v1519_v29  ;;  %v489_v61 = vmul.f32 %v1647_v32, %v1527_v33  ;;  %v523_v56 = vadd.f32 %v519_v52, %v515_v17  ;;  %v514_v55 = vadd.f32 %v510_v9, %v506_v8 }
  0x57   : > { %759 = vmatpush1.msra.mxu1 %v554_v10  ;;  %653 = vmatprep.subr.mxu0 %v521_v11  ;;  %v497_v41 = vmul.f32 %v1660_v2, %v1531_v35  ;;  %v520_v15 = vadd.f32 %v516_v37, %v512_v63  ;;  %v487_v31 = vmul.f32 %v1663_v3, %v1537_v40 }
  0x58   : > { %v493_v20 = vadd.f32 %v489_v61, %v485_v62  ;;  %v491_v57 = vmul.f32 %v1671_v42, %v1543_v47  ;;  %760 = vmatprep.subr.mxu1 %v523_v56  ;;  %v522_v59 = vadd.f32 %v518_v26, %v514_v55  ;;  %v499_v21 = vmul.f32 %v1674_v0, %v1547_v49 }
  0x59   : > { %v484_v52 = vmul.f32 %v1677_v60, %v1555_v5  ;;  %v488_v53 = vmul.f32 %v1686_v44, %v1559_v6  ;;  %654 = vmatpush1.msra.mxu0 %v520_v15  ;;  %v496_v62 = vmul.f32 %v1689_v18, %v1567_v16  ;;  %v486_v63 = vmul.f32 %v1692_v23, %v1575_v22 }
  0x5a   : > { %v501_v37 = vadd.f32 %v497_v41, %v493_v20  ;;  %v495_v61 = vadd.f32 %v491_v57, %v487_v31  ;;  %761 = vmatpush1.msra.mxu1 %v522_v59  ;;  %v490_v56 = vmul.f32 %v458_v50, %v1579_v27  ;;  %v498_v8 = vmul.f32 %v462_v34, %v1583_v28 }
  0x5b   : > { %v492_v55 = vadd.f32 %v488_v53, %v484_v52  ;;  %v465_v10 = vmul.f32 %v1636_v30, %v1591_v51  ;;  %v469_v17 = vmul.f32 %v1647_v32, %v1599_v36  ;;  %v477_v9 = vmul.f32 %v1660_v2, %v1619_v45 }
  0x5c   : > { %655 = vmatprep.subr.mxu0 %v501_v37  ;;  %v503_v11 = vadd.f32 %v499_v21, %v495_v61  ;;  %v467_v26 = vmul.f32 %v1663_v3, %v1606_v4  ;;  %v494_v15 = vadd.f32 %v490_v56, %v486_v63  ;;  %v471_v20 = vmul.f32 %v1671_v42, %v1612_v12  ;;  %v449_v37 = vld [vmem:[%s1394_s12 + $0x8] sm:$0xff]  ;;  %v448_v63 = vld [vmem:[%s1394_s12] sm:$0xff]  ;;  %v602_v56 = vld [vmem:[%s1991_s2 + $0x10] sm:$0xff] }
  0x5d   : > { %v500_v41 = vadd.f32 %v496_v62, %v492_v55  ;;  %v479_v31 = vmul.f32 %v1674_v0, %v1622_v13  ;;  %v473_v30 = vadd.f32 %v469_v17, %v465_v10  ;;  %v464_v57 = vmul.f32 %v1677_v60, %v1616_v38  ;;  %v451_v62 = vld [vmem:[%s1394_s12 + $0x18] sm:$0xff]  ;;  %v450_v55 = vld [vmem:[%s1394_s12 + $0x10] sm:$0xff]  ;;  %v604_v10 = vld [vmem:[%s1991_s2 + $0x20] sm:$0xff] }
  0x5e   : > { %762 = vmatprep.subr.mxu1 %v503_v11  ;;  %v468_v32 = vmul.f32 %v1686_v44, %v1628_v46  ;;  %v476_v2 = vmul.f32 %v1689_v18, %v1633_v39  ;;  %v502_v3 = vadd.f32 %v498_v8, %v494_v15  ;;  %v475_v42 = vadd.f32 %v471_v20, %v467_v26  ;;  %v603_v8 = vld [vmem:[%s1991_s2 + $0x18] sm:$0xff]  ;;  %v605_v11 = vld [vmem:[%s1991_s2 + $0x28] sm:$0xff]  ;;  %v606_v17 = vld [vmem:[%s1991_s2 + $0x30] sm:$0xff] }
  0x5f   : > { %656 = vmatpush1.msra.mxu0 %v500_v41  ;;  %v466_v0 = vmul.f32 %v1692_v23, %v1653_v48  ;;  %v470_v59 = vmul.f32 %v458_v50, %v1657_v58  ;;  %v481_v21 = vadd.f32 %v477_v9, %v473_v30  ;;  %v478_v52 = vmul.f32 %v462_v34, %v1666_v43  ;;  %v600_v23 = vld [vmem:[%s1991_s2] sm:$0xff]  ;;  %v601_v34 = vld [vmem:[%s1991_s2 + $0x8] sm:$0xff] }
  0x60   : > { %v472_v60 = vadd.f32 %v468_v32, %v464_v57  ;;  %763 = vmatpush1.msra.mxu1 %v502_v3  ;;  %v483_v44 = vadd.f32 %v479_v31, %v475_v42  ;;  %v2014_v50 = vmov 0.0  }
  0x61   : > { %v474_v53 = vadd.f32 %v470_v59, %v466_v0  ;;  %657 = vmatprep.subr.mxu0 %v481_v21 }
  0x62   : > { %v480_v18 = vadd.f32 %v476_v2, %v472_v60  ;;  %764 = vmatprep.subr.mxu1 %v483_v44 }
  0x63   : > { %v482_v61 = vadd.f32 %v478_v52, %v474_v53 }
  0x64   : > { %658 = vmatpush1.msra.mxu0 %v480_v18 }
  0x65   : > { %765 = vmatpush1.msra.mxu1 %v482_v61  ;;  %659 = vmatprep.subr.mxu0 %v449_v37 }
  0x66   : > { %766 = vmatprep.subr.mxu1 %v451_v62  ;;  %660 = vmatpush1.msra.mxu0 %v448_v63 }
  0x67   : > { %767 = vmatpush1.msra.mxu1 %v450_v55  ;;  %1159 = vmatmul.mubr.msk.f32.vlgmr.msra.gmra.mxu0 %vm607_vm1, %v600_v23 }
  0x68   : > { %1168 = vmatmul.mubr.msk.f32.vlgmr.msra.gmra.mxu1 %vm607_vm1, %v600_v23  ;;  %699 = vmatprep.mubr.f32.mxu0 %v2014_v50 }
  0x69   : > { %806 = vmatprep.mubr.f32.mxu1 %v2014_v50 }
  0x6b   : > { %1160 = vmatmul.mubr.msk.f32.gmra.mxu0 %vm607_vm1, %v601_v34 }
  0x6c   : > { %1169 = vmatmul.mubr.msk.f32.gmra.mxu1 %vm607_vm1, %v601_v34  ;;  %705 = vmatprep.mubr.f32.mxu0 %v2014_v50 }
  0x6d   : > { %812 = vmatprep.mubr.f32.mxu1 %v2014_v50 }
  0x6f   : > { %1161 = vmatmul.mubr.msk.f32.gmra.mxu0 %vm607_vm1, %v602_v56 }
  0x70   : > { %1170 = vmatmul.mubr.msk.f32.gmra.mxu1 %vm607_vm1, %v602_v56  ;;  %711 = vmatprep.mubr.f32.mxu0 %v2014_v50 }
  0x71   : > { %818 = vmatprep.mubr.f32.mxu1 %v2014_v50 }
  0x73   : > { %1162 = vmatmul.mubr.msk.f32.gmra.mxu0 %vm607_vm1, %v603_v8 }
  0x74   : > { %1171 = vmatmul.mubr.msk.f32.gmra.mxu1 %vm607_vm1, %v603_v8  ;;  %717 = vmatprep.mubr.f32.mxu0 %v2014_v50 }
  0x75   : > { %824 = vmatprep.mubr.f32.mxu1 %v2014_v50 }
  0x77   : > { %1163 = vmatmul.mubr.msk.f32.gmra.mxu0 %vm607_vm1, %v604_v10 }
  0x78   : > { %1172 = vmatmul.mubr.msk.f32.gmra.mxu1 %vm607_vm1, %v604_v10  ;;  %723 = vmatprep.mubr.f32.mxu0 %v2014_v50 }
  0x79   : > { %830 = vmatprep.mubr.f32.mxu1 %v2014_v50 }
  0x7b   : > { %1164 = vmatmul.mubr.msk.f32.gmra.mxu0 %vm607_vm1, %v605_v11 }
  0x7c   : > { %1173 = vmatmul.mubr.msk.f32.gmra.mxu1 %vm607_vm1, %v605_v11  ;;  %729 = vmatprep.mubr.f32.mxu0 %v2014_v50 }
  0x7d   : > { %836 = vmatprep.mubr.f32.mxu1 %v2014_v50 }
  0x7f   : > { %1165 = vmatmul.mubr.msk.f32.gmra.mxu0 %vm607_vm1, %v606_v17 }
  0x80   : > { %1174 = vmatmul.mubr.msk.f32.gmra.mxu1 %vm607_vm1, %v606_v17 }
 0x127   : > { %v695_v9 = vpop.f32.mrf.mxu0 }
 0x128   : > { %843 = vst [vmem:[%s1812_s7] sm:$0xff] %v695_v9  ;;  %v802_v26 = vpop.f32.mrf.mxu1 }
 0x129   : > { %845 = vst [vmem:[%s1812_s7 + $0x10] sm:$0xff] %v802_v26  ;;  %v697_v41 = vpop.f32.mrf.mxu0 }
 0x12a   : > { %844 = vst [vmem:[%s1812_s7 + $0x8] sm:$0xff] %v697_v41  ;;  %v804_v15 = vpop.f32.mrf.mxu1 }
 0x12b   : > { %846 = vst [vmem:[%s1812_s7 + $0x18] sm:$0xff] %v804_v15  ;;  %v701_v20 = vpop.f32.mrf.mxu0 }
 0x12c   : > { %v808_v31 = vpop.f32.mrf.mxu1  ;;  %v847_v30 = vmul.f32 %v701_v20, %v1616_v38  ;;  %v871_v57 = vmul.f32 %v701_v20, %v1628_v46  ;;  %v895_v2 = vmul.f32 %v701_v20, %v1633_v39 }
 0x12d   : > { %v703_v32 = vpop.f32.mrf.mxu0  ;;  %v849_v3 = vmul.f32 %v808_v31, %v1653_v48  ;;  %v873_v42 = vmul.f32 %v808_v31, %v1657_v58  ;;  %v897_v0 = vmul.f32 %v808_v31, %v1666_v43 }
 0x12e   : > { %v810_v59 = vpop.f32.mrf.mxu1  ;;  %v848_v21 = vmul.f32 %v703_v32, %v1591_v51  ;;  %v872_v60 = vmul.f32 %v703_v32, %v1599_v36  ;;  %v896_v52 = vmul.f32 %v703_v32, %v1619_v45 }
 0x12f   : > { %v850_v44 = vmul.f32 %v810_v59, %v1606_v4  ;;  %v707_v53 = vpop.f32.mrf.mxu0  ;;  %v874_v18 = vmul.f32 %v810_v59, %v1612_v12  ;;  %v898_v55 = vmul.f32 %v810_v59, %v1622_v13 }
 0x130   : > { %v851_v37 = vmul.f32 %v707_v53, %v1555_v5  ;;  %v875_v61 = vmul.f32 %v707_v53, %v1559_v6  ;;  %v899_v62 = vmul.f32 %v707_v53, %v1567_v16  ;;  %v814_v63 = vpop.f32.mrf.mxu1 }
 0x131   : > { %v853_v23 = vmul.f32 %v814_v63, %v1575_v22  ;;  %v877_v50 = vmul.f32 %v814_v63, %v1579_v27  ;;  %v901_v34 = vmul.f32 %v814_v63, %v1583_v28  ;;  %v709_v56 = vpop.f32.mrf.mxu0 }
 0x132   : > { %v855_v8 = vadd.f32 %v851_v37, %v847_v30  ;;  %v879_v10 = vadd.f32 %v875_v61, %v871_v57  ;;  %v903_v11 = vadd.f32 %v899_v62, %v895_v2  ;;  %v852_v17 = vmul.f32 %v709_v56, %v1519_v29  ;;  %v816_v9 = vpop.f32.mrf.mxu1 }
 0x133   : > { %v857_v26 = vadd.f32 %v853_v23, %v849_v3  ;;  %v881_v41 = vadd.f32 %v877_v50, %v873_v42  ;;  %v905_v15 = vadd.f32 %v901_v34, %v897_v0  ;;  %v876_v20 = vmul.f32 %v709_v56, %v1527_v33  ;;  %v713_v31 = vpop.f32.mrf.mxu0 }
 0x134   : > { %v856_v32 = vadd.f32 %v852_v17, %v848_v21  ;;  %v900_v59 = vmul.f32 %v709_v56, %v1531_v35  ;;  %v854_v53 = vmul.f32 %v816_v9, %v1537_v40  ;;  %v878_v63 = vmul.f32 %v816_v9, %v1543_v47  ;;  %v820_v28 = vpop.f32.mrf.mxu1 }
 0x135   : > { %v880_v30 = vadd.f32 %v876_v20, %v872_v60  ;;  %v902_v57 = vmul.f32 %v816_v9, %v1547_v49  ;;  %v859_v2 = vmul.f32 %v713_v31, %v1458_v1  ;;  %v883_v3 = vmul.f32 %v713_v31, %v1473_v7  ;;  %v715_v42 = vpop.f32.mrf.mxu0 }
 0x136   : > { %v904_v0 = vadd.f32 %v900_v59, %v896_v52  ;;  %v858_v37 = vadd.f32 %v854_v53, %v850_v44  ;;  %v882_v21 = vadd.f32 %v878_v63, %v874_v18  ;;  %v907_v61 = vmul.f32 %v713_v31, %v1489_v14  ;;  %v822_v62 = vpop.f32.mrf.mxu1  ;;  %v2015_v31 = vld [vmem:[#allocation5_spill] sm:$0xff]  ;;  %v2017_v59 = vld [vmem:[#allocation7_spill] sm:$0xff] }
 0x137   : > { %v906_v23 = vadd.f32 %v902_v57, %v898_v55  ;;  %v863_v50 = vadd.f32 %v859_v2, %v855_v8  ;;  %v887_v34 = vadd.f32 %v883_v3, %v879_v10  ;;  %v861_v60 = vmul.f32 %v820_v28, %v1499_v19  ;;  %v719_v56 = vpop.f32.mrf.mxu0  ;;  %v2016_v8 = vld [vmem:[#allocation6_spill] sm:$0xff]  ;;  %v2018_v2 = vld [vmem:[#allocation8_spill] sm:$0xff] }
 0x138   : > { %v911_v17 = vadd.f32 %v907_v61, %v903_v11  ;;  %v885_v9 = vmul.f32 %v820_v28, %v1510_v24  ;;  %v909_v20 = vmul.f32 %v820_v28, %v1513_v25  ;;  %v860_v52 = vmul.f32 %v715_v42, %v1427_v54  ;;  %v826_v44 = vpop.f32.mrf.mxu1 }
 0x139   : > { %867 = vst [vmem:[%s1812_s7 + $0x20] sm:$0xff] %v863_v50  ;;  %891 = vst [vmem:[%s1812_s7 + $0x40] sm:$0xff] %v887_v34  ;;  %v865_v18 = vadd.f32 %v861_v60, %v857_v26  ;;  %v884_v55 = vmul.f32 %v715_v42, %v2015_v31  ;;  %v908_v10 = vmul.f32 %v715_v42, %v2016_v8  ;;  %v721_v11 = vpop.f32.mrf.mxu0  ;;  %v2019_v42 = vld [vmem:[#allocation9_spill] sm:$0xff] }
 0x13a   : > { %v862_v53 = vmul.f32 %v822_v62, %v2017_v59  ;;  %915 = vst [vmem:[%s1812_s7 + $0x60] sm:$0xff] %v911_v17  ;;  %v889_v63 = vadd.f32 %v885_v9, %v881_v41  ;;  %v913_v28 = vadd.f32 %v909_v20, %v905_v15  ;;  %v864_v57 = vadd.f32 %v860_v52, %v856_v32  ;;  %v828_v61 = vpop.f32.mrf.mxu1 }
 0x13b   : > { %v886_v3 = vmul.f32 %v822_v62, %v2018_v2  ;;  %869 = vst [vmem:[%s1812_s7 + $0x30] sm:$0xff] %v865_v18  ;;  %v888_v26 = vadd.f32 %v884_v55, %v880_v30  ;;  %v912_v50 = vadd.f32 %v908_v10, %v904_v0  ;;  %v910_v60 = vmul.f32 %v822_v62, %v2019_v42  ;;  %v725_v8 = vpop.f32.mrf.mxu0 }
 0x13c   : > { %v866_v34 = vadd.f32 %v862_v53, %v858_v37  ;;  %893 = vst [vmem:[%s1812_s7 + $0x50] sm:$0xff] %v889_v63  ;;  %917 = vst [vmem:[%s1812_s7 + $0x70] sm:$0xff] %v913_v28  ;;  %v919_v15 = vmul.f32 %v719_v56, %v1616_v38  ;;  %v943_v32 = vmul.f32 %v719_v56, %v1628_v46  ;;  %v832_v9 = vpop.f32.mrf.mxu1 }
 0x13d   : > { %868 = vst [vmem:[%s1812_s7 + $0x28] sm:$0xff] %v864_v57  ;;  %v890_v41 = vadd.f32 %v886_v3, %v882_v21  ;;  %v967_v17 = vmul.f32 %v719_v56, %v1633_v39  ;;  %892 = vst [vmem:[%s1812_s7 + $0x48] sm:$0xff] %v888_v26  ;;  %v914_v30 = vadd.f32 %v910_v60, %v906_v23  ;;  %v727_v20 = vpop.f32.mrf.mxu0 }
 0x13e   : > { %916 = vst [vmem:[%s1812_s7 + $0x68] sm:$0xff] %v912_v50  ;;  %870 = vst [vmem:[%s1812_s7 + $0x38] sm:$0xff] %v866_v34  ;;  %v921_v0 = vmul.f32 %v826_v44, %v1653_v48  ;;  %v945_v37 = vmul.f32 %v826_v44, %v1657_v58  ;;  %v969_v62 = vmul.f32 %v826_v44, %v1666_v43  ;;  %v834_v56 = vpop.f32.mrf.mxu1  ;;  %v2020_v44 = vld [vmem:[#allocation10_spill] sm:$0xff] }
 0x13f   : > { %894 = vst [vmem:[%s1812_s7 + $0x58] sm:$0xff] %v890_v41  ;;  %v920_v38 = vmul.f32 %v721_v11, %v1591_v51  ;;  %v944_v46 = vmul.f32 %v721_v11, %v1599_v36  ;;  %v968_v39 = vmul.f32 %v721_v11, %v1619_v45  ;;  %v922_v21 = vmul.f32 %v828_v61, %v1606_v4  ;;  %v731_v10 = vpop.f32.mrf.mxu0 }
 0x140   : > { %918 = vst [vmem:[%s1812_s7 + $0x78] sm:$0xff] %v914_v30  ;;  %v946_v23 = vmul.f32 %v828_v61, %v1612_v12  ;;  %v970_v48 = vmul.f32 %v828_v61, %v1622_v13  ;;  %v923_v58 = vmul.f32 %v725_v8, %v1555_v5  ;;  %v947_v43 = vmul.f32 %v725_v8, %v1559_v6  ;;  %v838_v13 = vpop.f32.mrf.mxu1 }
 0x141   : > { %v971_v52 = vmul.f32 %v725_v8, %v1567_v16  ;;  %v925_v51 = vmul.f32 %v832_v9, %v1575_v22  ;;  %v949_v36 = vmul.f32 %v832_v9, %v1579_v27  ;;  %v973_v45 = vmul.f32 %v832_v9, %v2020_v44  ;;  %v733_v50 = vpop.f32.mrf.mxu0 }
 0x142   : > { %v927_v18 = vadd.f32 %v923_v58, %v919_v15  ;;  %v951_v4 = vadd.f32 %v947_v43, %v943_v32  ;;  %v924_v55 = vmul.f32 %v727_v20, %v1519_v29  ;;  %v948_v12 = vmul.f32 %v727_v20, %v1527_v33  ;;  %v2021_v15 = vld [vmem:[#allocation6_spill] sm:$0xff] }
 0x143   : > { %v975_v53 = vadd.f32 %v971_v52, %v967_v17  ;;  %v929_v5 = vadd.f32 %v925_v51, %v921_v0  ;;  %v953_v11 = vadd.f32 %v949_v36, %v945_v37  ;;  %v977_v6 = vadd.f32 %v973_v45, %v969_v62  ;;  %v1033_v58 = vld [vmem:[%s1812_s7 + $0x50] sm:$0xff] (%p1290_p5)  ;;  %v1037_v52 = vld [vmem:[%s1812_s7 + $0x60] sm:$0xff] (%p1290_p5) }
 0x144   : > { %v928_v63 = vadd.f32 %v924_v55, %v920_v38  ;;  %v952_v16 = vadd.f32 %v948_v12, %v944_v46  ;;  %v972_v22 = vmul.f32 %v727_v20, %v1531_v35  ;;  %v926_v27 = vmul.f32 %v834_v56, %v1537_v40  ;;  %v840_v35 = vpop.f32.mrf.mxu1  ;;  %v1017_v20 = vld [vmem:[%s1812_s7 + $0x10] sm:$0xff] (%p1290_p5)  ;;  %v1019_v38 = vld [vmem:[%s1812_s7 + $0x18] sm:$0xff] (%p1290_p5)  ;;  %v1021_v46 = vld [vmem:[%s1812_s7 + $0x20] sm:$0xff] (%p1290_p5)  ;;  %1034 = vst [vmem:[%s1924_s21 + $0x90] sm:$0xff] (%p1290_p5), %v1033_v58 }
 0x145   : > { %v950_v8 = vmul.f32 %v834_v56, %v1543_v47  ;;  %v974_v28 = vmul.f32 %v834_v56, %v1547_v49  ;;  %v931_v29 = vmul.f32 %v731_v10, %v1458_v1  ;;  %v955_v33 = vmul.f32 %v731_v10, %v1473_v7  ;;  %1018 = vst [vmem:[%s1924_s21 + $0x10] sm:$0xff] (%p1290_p5), %v1017_v20  ;;  %v1027_v56 = vld [vmem:[%s1812_s7 + $0x38] sm:$0xff] (%p1290_p5)  ;;  %v1039_v51 = vld [vmem:[%s1812_s7 + $0x68] sm:$0xff] (%p1290_p5)  ;;  %v1041_v36 = vld [vmem:[%s1812_s7 + $0x70] sm:$0xff] (%p1290_p5) }
 0x146   : > { %v976_v57 = vadd.f32 %v972_v22, %v968_v39  ;;  %v930_v3 = vadd.f32 %v926_v27, %v922_v21  ;;  %v979_v61 = vmul.f32 %v731_v10, %v1489_v14  ;;  %v933_v26 = vmul.f32 %v838_v13, %v1499_v19  ;;  %v1023_v39 = vld [vmem:[%s1812_s7 + $0x28] sm:$0xff] (%p1290_p5)  ;;  %1020 = vst [vmem:[%s1924_s21 + $0x18] sm:$0xff] (%p1290_p5), %v1019_v38  ;;  %v1025_v21 = vld [vmem:[%s1812_s7 + $0x30] sm:$0xff] (%p1290_p5)  ;;  %v1035_v43 = vld [vmem:[%s1812_s7 + $0x58] sm:$0xff] (%p1290_p5) }
 0x147   : > { %v954_v40 = vadd.f32 %v950_v8, %v946_v23  ;;  %v978_v47 = vadd.f32 %v974_v28, %v970_v48  ;;  %v935_v34 = vadd.f32 %v931_v29, %v927_v18  ;;  %v959_v49 = vadd.f32 %v955_v33, %v951_v4  ;;  %1022 = vst [vmem:[%s1924_s21 + $0x40] sm:$0xff] (%p1290_p5), %v1021_v46  ;;  %v1029_v23 = vld [vmem:[%s1812_s7 + $0x40] sm:$0xff] (%p1290_p5)  ;;  %v1031_v48 = vld [vmem:[%s1812_s7 + $0x48] sm:$0xff] (%p1290_p5)  ;;  %v1043_v44 = vld [vmem:[%s1812_s7 + $0x78] sm:$0xff] (%p1290_p5) }
 0x148   : > { %v983_v60 = vadd.f32 %v979_v61, %v975_v53  ;;  %v937_v1 = vadd.f32 %v933_v26, %v929_v5  ;;  %v957_v41 = vmul.f32 %v838_v13, %v1510_v24  ;;  %v981_v7 = vmul.f32 %v838_v13, %v1513_v25  ;;  %1024 = vst [vmem:[%s1924_s21 + $0x48] sm:$0xff] (%p1290_p5), %v1023_v39 }
 0x149   : > { %939 = vst [vmem:[%s1812_s7 + $0x80] sm:$0xff] %v935_v34  ;;  %963 = vst [vmem:[%s1812_s7 + $0xa0] sm:$0xff] %v959_v49  ;;  %v932_v14 = vmul.f32 %v733_v50, %v1427_v54  ;;  %v956_v19 = vmul.f32 %v733_v50, %v2015_v31  ;;  %v980_v32 = vmul.f32 %v733_v50, %v2021_v15 }
 0x14a   : > { %v934_v17 = vmul.f32 %v840_v35, %v2017_v59  ;;  %987 = vst [vmem:[%s1812_s7 + $0xc0] sm:$0xff] %v983_v60  ;;  %941 = vst [vmem:[%s1812_s7 + $0x90] sm:$0xff] %v937_v1  ;;  %v961_v24 = vadd.f32 %v957_v41, %v953_v11  ;;  %v985_v25 = vadd.f32 %v981_v7, %v977_v6 }
 0x14b   : > { %v958_v9 = vmul.f32 %v840_v35, %v2018_v2  ;;  %v982_v54 = vmul.f32 %v840_v35, %v2019_v42  ;;  %v936_v30 = vadd.f32 %v932_v14, %v928_v63  ;;  %v960_v31 = vadd.f32 %v956_v19, %v952_v16  ;;  %997 = sbr.rel (!%p1290_p5) target bundleno = 347 (0x15b), region = 82  ;;  %v1013_v2 = vld [vmem:[%s1812_s7] sm:$0xff] (%p1290_p5)  ;;  %v1015_v42 = vld [vmem:[%s1812_s7 + $0x8] sm:$0xff] (%p1290_p5)  ;;  %1026 = vst [vmem:[%s1924_s21 + $0x50] sm:$0xff] (%p1290_p5), %v1025_v21 }
 0x14c   : > { %v984_v0 = vadd.f32 %v980_v32, %v976_v57  ;;  %v938_v37 = vadd.f32 %v934_v17, %v930_v3  ;;  %965 = vst [vmem:[%s1812_s7 + $0xb0] sm:$0xff] %v961_v24  ;;  %989 = vst [vmem:[%s1812_s7 + $0xd0] sm:$0xff] %v985_v25 }
 0x14d   : > { %v962_v59 = vadd.f32 %v958_v9, %v954_v40  ;;  %v986_v62 = vadd.f32 %v982_v54, %v978_v47  ;;  %940 = vst [vmem:[%s1812_s7 + $0x88] sm:$0xff] %v936_v30  ;;  %964 = vst [vmem:[%s1812_s7 + $0xa8] sm:$0xff] %v960_v31 }
 0x14e   : > { %988 = vst [vmem:[%s1812_s7 + $0xc8] sm:$0xff] %v984_v0  ;;  %942 = vst [vmem:[%s1812_s7 + $0x98] sm:$0xff] %v938_v37 }
 0x14f   : > { %966 = vst [vmem:[%s1812_s7 + $0xb8] sm:$0xff] %v962_v59  ;;  %990 = vst [vmem:[%s1812_s7 + $0xd8] sm:$0xff] %v986_v62 }
 0x150   : > { %1014 = vst [vmem:[%s1924_s21] sm:$0xff] %v1013_v2  ;;  %1016 = vst [vmem:[%s1924_s21 + $0x8] sm:$0xff] %v1015_v42  ;;  %v1045_v45 = vld [vmem:[%s1812_s7 + $0x80] sm:$0xff] }
 0x151   : > { %1028 = vst [vmem:[%s1924_s21 + $0x58] sm:$0xff] %v1027_v56  ;;  %1030 = vst [vmem:[%s1924_s21 + $0x80] sm:$0xff] %v1029_v23  ;;  %v1049_v4 = vld [vmem:[%s1812_s7 + $0x90] sm:$0xff]  ;;  %v1053_v12 = vld [vmem:[%s1812_s7 + $0xa0] sm:$0xff] }
 0x152   : > { %1032 = vst [vmem:[%s1924_s21 + $0x88] sm:$0xff] %v1031_v48  ;;  %1036 = vst [vmem:[%s1924_s21 + $0x98] sm:$0xff] %v1035_v43  ;;  %v1061_v5 = vld [vmem:[%s1812_s7 + $0xc0] sm:$0xff] }
 0x153   : > { %1038 = vst [vmem:[%s1924_s21 + $0xc0] sm:$0xff] %v1037_v52  ;;  %1040 = vst [vmem:[%s1924_s21 + $0xc8] sm:$0xff] %v1039_v51  ;;  %v1057_v13 = vld [vmem:[%s1812_s7 + $0xb0] sm:$0xff] }
 0x154   : > { %1042 = vst [vmem:[%s1924_s21 + $0xd0] sm:$0xff] %v1041_v36  ;;  %v1047_v18 = vld [vmem:[%s1812_s7 + $0x88] sm:$0xff]  ;;  %1044 = vst [vmem:[%s1924_s21 + $0xd8] sm:$0xff] %v1043_v44  ;;  %v1065_v6 = vld [vmem:[%s1812_s7 + $0xd0] sm:$0xff] }
 0x155   : > { %1046 = vst [vmem:[%s1924_s21 + $0x100] sm:$0xff] %v1045_v45  ;;  %1048 = vst [vmem:[%s1924_s21 + $0x108] sm:$0xff] %v1047_v18  ;;  %v1051_v55 = vld [vmem:[%s1812_s7 + $0x98] sm:$0xff]  ;;  %v1055_v10 = vld [vmem:[%s1812_s7 + $0xa8] sm:$0xff] }
 0x156   : > { %1050 = vst [vmem:[%s1924_s21 + $0x110] sm:$0xff] %v1049_v4  ;;  %1052 = vst [vmem:[%s1924_s21 + $0x118] sm:$0xff] %v1051_v55  ;;  %v1059_v53 = vld [vmem:[%s1812_s7 + $0xb8] sm:$0xff]  ;;  %v1063_v11 = vld [vmem:[%s1812_s7 + $0xc8] sm:$0xff] }
 0x157   : > { %1054 = vst [vmem:[%s1924_s21 + $0x140] sm:$0xff] %v1053_v12  ;;  %1056 = vst [vmem:[%s1924_s21 + $0x148] sm:$0xff] %v1055_v10  ;;  %v1067_v63 = vld [vmem:[%s1812_s7 + $0xd8] sm:$0xff] }
 0x158   : > { %1058 = vst [vmem:[%s1924_s21 + $0x150] sm:$0xff] %v1057_v13  ;;  %1060 = vst [vmem:[%s1924_s21 + $0x158] sm:$0xff] %v1059_v53 }
 0x159   : > { %1062 = vst [vmem:[%s1924_s21 + $0x180] sm:$0xff] %v1061_v5  ;;  %1064 = vst [vmem:[%s1924_s21 + $0x188] sm:$0xff] %v1063_v11 }
 0x15a   : > { %1066 = vst [vmem:[%s1924_s21 + $0x190] sm:$0xff] %v1065_v6  ;;  %1068 = vst [vmem:[%s1924_s21 + $0x198] sm:$0xff] %v1067_v63 }
 0x15b PF: > { %p10_p10 = scmp.ge.s32.totalorder %s1273_s16, 4   ;;  %s2022_s12 = smov %s1228_s13 }
 0x15c   : > { %s2023_s13 = smov %s1284_s19  ;;  %s2024_s14 = smov %s1273_s16 }
 0x15d   :  { %12 = sbr.rel (!%p10_p10) target bundleno = 2 (0x2), region = 144 }

</bundles_post_ra>
